<compile_context>
chip_gen: v7x
topology: tpu7x:2x2x1
jax: 0.10.0
libtpu: 0.0.40
codegen_flags: <defaults>
</compile_context>

<pallas_src>
import functools

import jax
import jax.numpy as jnp
from jax.experimental import pallas as pl
from jax.experimental.pallas import tpu as pltpu

EMBEDDING_DIM = 128
NUM_EMBEDDING = 20

# Vocabulary, mirroring RecurrentEncoder.__init__ (independent_variable_maxsize=2).
_NUMERICAL_FUNCTIONS = ["add", "sub", "mul", "sqr", "inv"]
_LOGIC_FUNCTIONS = ["BiggerOrEqual", "Equal", "Not negative", "Real"]
_INPUT_ENTITY_NAMES = ["input1", "input2"]
_SPECIAL_STRINGS = ["(", ")", ",", "<SOS>", "<EOS>"]
STRING2EMBED = _NUMERICAL_FUNCTIONS + _LOGIC_FUNCTIONS + _INPUT_ENTITY_NAMES + _SPECIAL_STRINGS
STRING2INDEX = {s: i for i, s in enumerate(STRING2EMBED)}


def _gru_seq_kernel(idx_ref, h0_ref, emb_ref, wih_ref, whh_ref,
                    b_rz_ref, b_in_ref, b_hn_ref, h_ref):
    """One grid step = one token of the recurrence.

    idx_ref : SMEM (T,)  int32   scalar-prefetched token indices
    h0_ref  : VMEM (1, D) f32    initial hidden state (resident, constant index_map)
    emb_ref : VMEM (V, D) f32    embedding table       (resident)
    wih_ref : VMEM (D, 3D) bf16  W_ih^T, gate order [r, z, n]   (resident)
    whh_ref : VMEM (D, 3D) bf16  W_hh^T                         (resident)
    b_rz_ref: VMEM (1, 2D) f32   b_ih[:2D] + b_hh[:2D]
    b_in_ref: VMEM (1, D)  f32   b_ih[2D:]
    b_hn_ref: VMEM (1, D)  f32   b_hh[2D:]
    h_ref   : VMEM (1, D)  f32   output block == running hidden state (resident)
    """
    d = h0_ref.shape[-1]
    t = pl.program_id(0)

    # The hidden state lives in the VMEM-resident output block across all grid steps.
    @pl.when(t == 0)
    def _():
        h_ref[...] = h0_ref[...]

    idx = idx_ref[t]
    # Embedding lookup: dynamic row gather from the VMEM-resident table.
    x = emb_ref[pl.ds(idx, 1), :]                       # (1, D) f32
    h = h_ref[...]                                      # (1, D) f32

    # MXU projections in bf16 with f32 accumulation: (1, D) @ (D, 3D) -> (1, 3D).
    gi = jnp.dot(x.astype(jnp.bfloat16), wih_ref[...],
                 preferred_element_type=jnp.float32)
    gh = jnp.dot(h.astype(jnp.bfloat16), whh_ref[...],
                 preferred_element_type=jnp.float32)

    # PyTorch GRU gate equations (gate chunks are 128-lane aligned static slices).
    rz = jax.nn.sigmoid(gi[:, :2 * d] + gh[:, :2 * d] + b_rz_ref[...])
    r = rz[:, :d]
    z = rz[:, d:]
    n = jnp.tanh(gi[:, 2 * d:] + b_in_ref[...] + r * (gh[:, 2 * d:] + b_hn_ref[...]))
    h_ref[...] = (1.0 - z) * n + z * h


@jax.jit
def _gru_sequence(idx, h0, embedding, w_ih_t, w_hh_t, b_rz, b_in, b_hn):
    """Run the GRU over a whole token-index sequence in one pallas_call.

    Returns the final hidden state (1, D) f32 (== final GRU output).
    """
    num_tokens = idx.shape[0]
    v, d = embedding.shape
    const = lambda t, idx_ref: (0, 0)   # resident across the whole grid

    grid_spec = pltpu.PrefetchScalarGridSpec(
        num_scalar_prefetch=1,
        grid=(num_tokens,),
        in_specs=[
            pl.BlockSpec((1, d), const),          # h0
            pl.BlockSpec((v, d), const),          # embedding table
            pl.BlockSpec((d, 3 * d), const),      # W_ih^T (bf16)
            pl.BlockSpec((d, 3 * d), const),      # W_hh^T (bf16)
            pl.BlockSpec((1, 2 * d), const),      # b_rz
            pl.BlockSpec((1, d), const),          # b_in
            pl.BlockSpec((1, d), const),          # b_hn
        ],
        out_specs=pl.BlockSpec((1, d), const),    # hidden state (resident accumulator)
    )
    return pl.pallas_call(
        _gru_seq_kernel,
        out_shape=jax.ShapeDtypeStruct((1, d), jnp.float32),
        grid_spec=grid_spec,
        compiler_params=pltpu.CompilerParams(
            dimension_semantics=("arbitrary",)),  # sequential recurrence
    )(idx, h0, embedding, w_ih_t, w_hh_t, b_rz, b_in, b_hn)


def init_params(key, num_embedding=NUM_EMBEDDING, embedding_dim=EMBEDDING_DIM):
    """Deterministic synthetic parameters with PyTorch-like uniform init."""
    d = embedding_dim
    k = 1.0 / jnp.sqrt(jnp.float32(d))
    keys = jax.random.split(key, 5)
    b_ih = jax.random.uniform(keys[3], (1, 3 * d), jnp.float32, -k, k)
    b_hh = jax.random.uniform(keys[4], (1, 3 * d), jnp.float32, -k, k)
    params = {
        "embedding": jax.random.normal(keys[0], (num_embedding, d), jnp.float32),
        # stored transposed + bf16: (D, 3D), gate order [r, z, n] along the 3D axis
        "w_ih_t": jax.random.uniform(keys[1], (d, 3 * d), jnp.float32, -k, k
                                     ).astype(jnp.bfloat16),
        "w_hh_t": jax.random.uniform(keys[2], (d, 3 * d), jnp.float32, -k, k
                                     ).astype(jnp.bfloat16),
        # pre-combined biases: r/z gates only ever need b_ih + b_hh
        "b_rz": b_ih[:, :2 * d] + b_hh[:, :2 * d],
        "b_in": b_ih[:, 2 * d:],
        "b_hn": b_hh[:, 2 * d:],
    }
    return params


def _tokens_to_indices(tokens):
    idx = [STRING2INDEX[t] for t in tokens]
    assert all(0 <= i < NUM_EMBEDDING for i in idx), "token index out of embedding range"
    return jnp.asarray(idx, dtype=jnp.int32)


def forward(params, gru_input, gru_hidden):
    """Mirror of RecurrentEncoder.forward (single token).

    gru_input : token string (key of STRING2INDEX)
    gru_hidden: (1, 1, D) f32
    returns (gru_output, gru_hidden), each (1, 1, D); they are equal.
    """
    idx = _tokens_to_indices([gru_input])
    h0 = gru_hidden.reshape(1, -1)
    h_new = _gru_sequence(idx, h0, params["embedding"],
                          params["w_ih_t"], params["w_hh_t"],
                          params["b_rz"], params["b_in"], params["b_hn"])
    d = h0.shape[-1]
    out = h_new.reshape(1, 1, d)
    return out, out


def init_hidden(embedding_dim=EMBEDDING_DIM):
    return jnp.zeros((1, 1, embedding_dim), dtype=jnp.float32)


def encode_entity(params, entity_name):
    """Mirror of RecurrentEncoder.encode_entity, fused into ONE pallas_call.

    The original loops over whitespace tokens and breaks after an "EOS" token
    (note: the vocabulary only contains "<EOS>", so as in PyTorch an actual "EOS"
    token would KeyError in the index lookup before the break is reached).
    """
    tokens = []
    for character in entity_name.split():
        tokens.append(character)
        if character == "EOS":
            break
    if not tokens:
        return None
    idx = _tokens_to_indices(tokens)
    h0 = init_hidden().reshape(1, -1)
    h_final = _gru_sequence(idx, h0, params["embedding"],
                            params["w_ih_t"], params["w_hh_t"],
                            params["b_rz"], params["b_in"], params["b_hn"])
    return h_final.reshape(1, 1, -1)


def _reference_gru_sequence(idx, h0, embedding, w_ih_t, w_hh_t, b_rz, b_in, b_hn):
    """Pure-JAX reference of the fused kernel (PyTorch GRU equations, bf16 weights)."""
    d = h0.shape[-1]
    wih = w_ih_t.astype(jnp.float32)
    whh = w_hh_t.astype(jnp.float32)
    h = h0
    for i in range(idx.shape[0]):
        x = embedding[idx[i]][None, :]
        gi = x.astype(jnp.bfloat16).astype(jnp.float32) @ wih
        gh = h.astype(jnp.bfloat16).astype(jnp.float32) @ whh
        rz = jax.nn.sigmoid(gi[:, :2 * d] + gh[:, :2 * d] + b_rz)
        r, z = rz[:, :d], rz[:, d:]
        n = jnp.tanh(gi[:, 2 * d:] + b_in + r * (gh[:, 2 * d:] + b_hn))
        h = (1.0 - z) * n + z * h
    return h


if __name__ == "__main__":
    key = jax.random.PRNGKey(0)
    params = init_params(key)

    # --- Single forward step (exactly what RecurrentEncoder.forward does). ---
    hidden0 = init_hidden()
    out, hidden1 = forward(params, "add", hidden0)
    jax.block_until_ready((out, hidden1))
    assert out.shape == (1, 1, EMBEDDING_DIM) and hidden1.shape == (1, 1, EMBEDDING_DIM)

    idx1 = _tokens_to_indices(["add"])
    ref_h1 = _reference_gru_sequence(idx1, hidden0.reshape(1, -1), params["embedding"],
                                     params["w_ih_t"], params["w_hh_t"],
                                     params["b_rz"], params["b_in"], params["b_hn"])
    assert jnp.allclose(hidden1.reshape(1, -1), ref_h1, atol=1e-3, rtol=1e-3)

    # --- Recurrent use, mirroring test_encoding's "add ( input1 , input2 )" entity. ---
    entity = "add ( input1 , input2 )"
    encoded = encode_entity(params, entity)
    jax.block_until_ready(encoded)
    assert encoded.shape == (1, 1, EMBEDDING_DIM)

    idx_seq = _tokens_to_indices(entity.split())
    ref_enc = _reference_gru_sequence(idx_seq, init_hidden().reshape(1, -1),
                                      params["embedding"],
                                      params["w_ih_t"], params["w_hh_t"],
                                      params["b_rz"], params["b_in"], params["b_hn"])
    assert jnp.allclose(encoded.reshape(1, -1), ref_enc, atol=1e-3, rtol=1e-3)

    print("KERNEL_OK")
</pallas_src>

<mosaic_0001>
module attributes {stable_mosaic.version = 11 : i64} {
  func.func @_gru_seq_kernel(%arg0: i32, %arg1: memref<1xi32, #tpu.memory_space<smem>>, %arg2: memref<1x128xf32, #tpu.memory_space<vmem>>, %arg3: memref<20x128xf32, #tpu.memory_space<vmem>>, %arg4: memref<128x384xbf16, #tpu.memory_space<vmem>>, %arg5: memref<128x384xbf16, #tpu.memory_space<vmem>>, %arg6: memref<1x256xf32, #tpu.memory_space<vmem>>, %arg7: memref<1x128xf32, #tpu.memory_space<vmem>>, %arg8: memref<1x128xf32, #tpu.memory_space<vmem>>, %arg9: memref<1x128xf32, #tpu.memory_space<vmem>>) attributes {dimension_semantics = [#tpu.dimension_semantics<arbitrary>], iteration_bounds = array<i64: 1>, scalar_prefetch = 1 : i64, scratch_operands = 0 : i64, tpu.core_type = #tpu.core_type<tc>, window_params = [{pipeline_mode = #tpu.pipeline_mode<synchronous>, transform_indices = @transform_0, window_bounds = array<i64: 1, 128>}, {pipeline_mode = #tpu.pipeline_mode<synchronous>, transform_indices = @transform_1, window_bounds = array<i64: 20, 128>}, {pipeline_mode = #tpu.pipeline_mode<synchronous>, transform_indices = @transform_2, window_bounds = array<i64: 128, 384>}, {pipeline_mode = #tpu.pipeline_mode<synchronous>, transform_indices = @transform_3, window_bounds = array<i64: 128, 384>}, {pipeline_mode = #tpu.pipeline_mode<synchronous>, transform_indices = @transform_4, window_bounds = array<i64: 1, 256>}, {pipeline_mode = #tpu.pipeline_mode<synchronous>, transform_indices = @transform_5, window_bounds = array<i64: 1, 128>}, {pipeline_mode = #tpu.pipeline_mode<synchronous>, transform_indices = @transform_6, window_bounds = array<i64: 1, 128>}, {pipeline_mode = #tpu.pipeline_mode<synchronous>, transform_indices = @transform_7, window_bounds = array<i64: 1, 128>}]} {
    %c0_i32 = arith.constant 0 : i32
    %0 = arith.cmpi eq, %arg0, %c0_i32 : i32
    %1 = arith.extui %0 : i1 to i32
    %c0_i32_0 = arith.constant 0 : i32
    %2 = arith.cmpi ne, %1, %c0_i32_0 : i32
    scf.if %2 {
      %c0_18 = arith.constant 0 : index
      %c0_19 = arith.constant 0 : index
      %41 = vector.load %arg2[%c0_18, %c0_19] : memref<1x128xf32, #tpu.memory_space<vmem>>, vector<1x128xf32>
      %c0_20 = arith.constant 0 : index
      %c0_21 = arith.constant 0 : index
      %42 = vector.load %arg9[%c0_20, %c0_21] : memref<1x128xf32, #tpu.memory_space<vmem>>, vector<1x128xf32>
      tpu.vector_store %arg9[%c0_20, %c0_21], %41 {strides = array<i32>} : memref<1x128xf32, #tpu.memory_space<vmem>>, vector<1x128xf32>,
    } else {
    }
    %3 = arith.index_cast %arg0 : i32 to index
    %4 = memref.load %arg1[%3] : memref<1xi32, #tpu.memory_space<smem>>
    %5 = arith.index_cast %4 : i32 to index
    %c0 = arith.constant 0 : index
    %6 = vector.load %arg3[%5, %c0] : memref<20x128xf32, #tpu.memory_space<vmem>>, vector<1x128xf32>
    %c0_1 = arith.constant 0 : index
    %c0_2 = arith.constant 0 : index
    %7 = vector.load %arg9[%c0_1, %c0_2] : memref<1x128xf32, #tpu.memory_space<vmem>>, vector<1x128xf32>
    %8 = arith.truncf %6 : vector<1x128xf32> to vector<1x128xbf16>
    %c0_3 = arith.constant 0 : index
    %c0_4 = arith.constant 0 : index
    %9 = vector.load %arg4[%c0_3, %c0_4] : memref<128x384xbf16, #tpu.memory_space<vmem>>, vector<128x384xbf16>
    %cst = arith.constant dense<0.000000e+00> : vector<1x384xf32>
    %10 = tpu.matmul %8, %9, %cst {dimension_numbers = #tpu.dot_dimension_numbers<[1], [0], [0], [1], [0, 0, 1, 1], [], []>} : vector<1x128xbf16>, vector<128x384xbf16>, vector<1x384xf32> -> vector<1x384xf32>
    %11 = arith.truncf %7 : vector<1x128xf32> to vector<1x128xbf16>
    %c0_5 = arith.constant 0 : index
    %c0_6 = arith.constant 0 : index
    %12 = vector.load %arg5[%c0_5, %c0_6] : memref<128x384xbf16, #tpu.memory_space<vmem>>, vector<128x384xbf16>
    %cst_7 = arith.constant dense<0.000000e+00> : vector<1x384xf32>
    %13 = tpu.matmul %11, %12, %cst_7 {dimension_numbers = #tpu.dot_dimension_numbers<[1], [0], [0], [1], [0, 0, 1, 1], [], []>} : vector<1x128xbf16>, vector<128x384xbf16>, vector<1x384xf32> -> vector<1x384xf32>
    %14 = vector.extract_strided_slice %10 {offsets = [0, 0], sizes = [1, 256], strides = [1, 1]} : vector<1x384xf32> to vector<1x256xf32>
    %15 = vector.extract_strided_slice %13 {offsets = [0, 0], sizes = [1, 256], strides = [1, 1]} : vector<1x384xf32> to vector<1x256xf32>
    %16 = arith.addf %14, %15 : vector<1x256xf32>
    %c0_8 = arith.constant 0 : index
    %c0_9 = arith.constant 0 : index
    %17 = vector.load %arg6[%c0_8, %c0_9] : memref<1x256xf32, #tpu.memory_space<vmem>>, vector<1x256xf32>
    %18 = arith.addf %16, %17 : vector<1x256xf32>
    %19 = arith.negf %18 : vector<1x256xf32>
    %20 = math.exp %19 : vector<1x256xf32>
    %cst_10 = arith.constant 1.000000e+00 : f32
    %21 = vector.broadcast %cst_10 : f32 to vector<1x256xf32>
    %22 = arith.addf %21, %20 : vector<1x256xf32>
    %23 = arith.divf %21, %22 : vector<1x256xf32>
    %24 = vector.extract_strided_slice %23 {offsets = [0, 0], sizes = [1, 128], strides = [1, 1]} : vector<1x256xf32> to vector<1x128xf32>
    %25 = vector.extract_strided_slice %23 {offsets = [0, 128], sizes = [1, 128], strides = [1, 1]} : vector<1x256xf32> to vector<1x128xf32>
    %26 = vector.extract_strided_slice %10 {offsets = [0, 256], sizes = [1, 128], strides = [1, 1]} : vector<1x384xf32> to vector<1x128xf32>
    %c0_11 = arith.constant 0 : index
    %c0_12 = arith.constant 0 : index
    %27 = vector.load %arg7[%c0_11, %c0_12] : memref<1x128xf32, #tpu.memory_space<vmem>>, vector<1x128xf32>
    %28 = arith.addf %26, %27 : vector<1x128xf32>
    %29 = vector.extract_strided_slice %13 {offsets = [0, 256], sizes = [1, 128], strides = [1, 1]} : vector<1x384xf32> to vector<1x128xf32>
    %c0_13 = arith.constant 0 : index
    %c0_14 = arith.constant 0 : index
    %30 = vector.load %arg8[%c0_13, %c0_14] : memref<1x128xf32, #tpu.memory_space<vmem>>, vector<1x128xf32>
    %31 = arith.addf %29, %30 : vector<1x128xf32>
    %32 = arith.mulf %24, %31 : vector<1x128xf32>
    %33 = arith.addf %28, %32 : vector<1x128xf32>
    %34 = math.tanh %33 : vector<1x128xf32>
    %cst_15 = arith.constant 1.000000e+00 : f32
    %35 = vector.broadcast %cst_15 : f32 to vector<1x128xf32>
    %36 = arith.subf %35, %25 : vector<1x128xf32>
    %37 = arith.mulf %36, %34 : vector<1x128xf32>
    %38 = arith.mulf %25, %7 : vector<1x128xf32>
    %39 = arith.addf %37, %38 : vector<1x128xf32>
    %c0_16 = arith.constant 0 : index
    %c0_17 = arith.constant 0 : index
    %40 = vector.load %arg9[%c0_16, %c0_17] : memref<1x128xf32, #tpu.memory_space<vmem>>, vector<1x128xf32>
    tpu.vector_store %arg9[%c0_16, %c0_17], %39 {strides = array<i32>} : memref<1x128xf32, #tpu.memory_space<vmem>>, vector<1x128xf32>,
    return
  }
  func.func @transform_0(%arg0: i32, %arg1: memref<1xi32, #tpu.memory_space<smem>>) -> (i32, i32) {
    %c0_i32 = arith.constant 0 : i32
    %c0_i32_0 = arith.constant 0 : i32
    %c0_i32_1 = arith.constant 0 : i32
    return %c0_i32, %c0_i32_0 : i32, i32
  }
  func.func @transform_1(%arg0: i32, %arg1: memref<1xi32, #tpu.memory_space<smem>>) -> (i32, i32) {
    %c0_i32 = arith.constant 0 : i32
    %c0_i32_0 = arith.constant 0 : i32
    %c0_i32_1 = arith.constant 0 : i32
    return %c0_i32, %c0_i32_0 : i32, i32
  }
  func.func @transform_2(%arg0: i32, %arg1: memref<1xi32, #tpu.memory_space<smem>>) -> (i32, i32) {
    %c0_i32 = arith.constant 0 : i32
    %c0_i32_0 = arith.constant 0 : i32
    %c0_i32_1 = arith.constant 0 : i32
    return %c0_i32, %c0_i32_0 : i32, i32
  }
  func.func @transform_3(%arg0: i32, %arg1: memref<1xi32, #tpu.memory_space<smem>>) -> (i32, i32) {
    %c0_i32 = arith.constant 0 : i32
    %c0_i32_0 = arith.constant 0 : i32
    %c0_i32_1 = arith.constant 0 : i32
    return %c0_i32, %c0_i32_0 : i32, i32
  }
  func.func @transform_4(%arg0: i32, %arg1: memref<1xi32, #tpu.memory_space<smem>>) -> (i32, i32) {
    %c0_i32 = arith.constant 0 : i32
    %c0_i32_0 = arith.constant 0 : i32
    %c0_i32_1 = arith.constant 0 : i32
    return %c0_i32, %c0_i32_0 : i32, i32
  }
  func.func @transform_5(%arg0: i32, %arg1: memref<1xi32, #tpu.memory_space<smem>>) -> (i32, i32) {
    %c0_i32 = arith.constant 0 : i32
    %c0_i32_0 = arith.constant 0 : i32
    %c0_i32_1 = arith.constant 0 : i32
    return %c0_i32, %c0_i32_0 : i32, i32
  }
  func.func @transform_6(%arg0: i32, %arg1: memref<1xi32, #tpu.memory_space<smem>>) -> (i32, i32) {
    %c0_i32 = arith.constant 0 : i32
    %c0_i32_0 = arith.constant 0 : i32
    %c0_i32_1 = arith.constant 0 : i32
    return %c0_i32, %c0_i32_0 : i32, i32
  }
  func.func @transform_7(%arg0: i32, %arg1: memref<1xi32, #tpu.memory_space<smem>>) -> (i32, i32) {
    %c0_i32 = arith.constant 0 : i32
    %c0_i32_0 = arith.constant 0 : i32
    %c0_i32_1 = arith.constant 0 : i32
    return %c0_i32, %c0_i32_0 : i32, i32
  }
}

</mosaic_0001>

<bundles_post_ra>
// kernel: _gru_sequence.1
= control target key start
LH: loop header
LB: loop body
LE: loop exit
PB: predicated region body
PF: predicated region fallthrough
CT: control target
= control target key end

     0   :  { %14 = vsyncpa [#allocation5], 0  ;;  %s1061_s0 = inlined_call_operand.<no memory space> [shape: s32[1], index: 0, kind: input, shape index: {}]   ;;  %s1062_s1 = inlined_call_operand.vmem [shape: f32[1,128], index: 1, kind: input, shape index: {}]   ;;  %s1063_s2 = inlined_call_operand.hbm [shape: f32[20,128], index: 2, kind: input, shape index: {}]   ;;  %s1064_s3 = inlined_call_operand.hbm [shape: bf16[128,384], index: 3, kind: input, shape index: {}]   ;;  %s1065_s4 = inlined_call_operand.hbm [shape: bf16[128,384], index: 4, kind: input, shape index: {}]   ;;  %s1066_s5 = inlined_call_operand.vmem [shape: f32[1,256], index: 5, kind: input, shape index: {}]   ;;  %s1067_s6 = inlined_call_operand.vmem [shape: f32[1,128], index: 6, kind: input, shape index: {}]   ;;  %s1068_s7 = inlined_call_operand.vmem [shape: f32[1,128], index: 7, kind: input, shape index: {}]   ;;  %s1069_s8 = inlined_call_operand.hbm [shape: f32[1,128], index: 8, kind: output, shape index: {}]  }
   0x1   :  { %15 = vsyncpa [#allocation8], 0 }
   0x2   :  { %16 = vsyncpa [#allocation6], 0  ;;  %s909_s27 = smov [#allocation7]   ;;  %s815_s9 = scalar_lea.hbm %s1064_s3, 3072 }
   0x3   :  { %s36_s28 = sshll.u32 %s909_s27, 4  ;;  %p816_p0 = scmp.ne.s32.totalorder %s1064_s3, %s815_s9  ;;  %s37_s28 = int_to_ptr.vmem [resolvable:$true] %s36_s28 }
   0x4   :  { %p819_p1 = scmp.lt.u32.totalorder %s815_s9, %s1064_s3 }
   0x6   :  { %p821_p2 = pnand %p819_p1, %p816_p0 }
   0x8   :  { %824 = shalt.err (!%p821_p2)
}
   0x9   :  { %s825_s14 = scalar_lea.vmem %s37_s28, 3072  ;;  %p830_p4 = scmp.lt.s32.totalorder %s37_s28, %s37_s28 }
   0xa   :  { %p826_p3 = scmp.ne.s32.totalorder %s37_s28, %s825_s14  ;;  %p831_p5 = scmp.lt.s32.totalorder %s825_s14, %s825_s14 }
   0xc   :  { %p832_p6 = por %p831_p5, %p830_p4 }
   0xe   :  { %p833_p7 = pnand %p832_p6, %p826_p3 }
  0x10   :  { %836 = shalt.err (!%p833_p7)
}
  0x11   :  { %s910_s15 = smov 192   ;;  %s911_s16 = smov 12  }
  0x12   :  { %42 = dma.hbm_to_vmem [thread:$0]  %s1064_s3, 3072, %s37_s28, [#allocation8], %s910_s15, %s910_s15, %s911_s16  }
  0x13   :  { %s912_s19 = smov [#allocation4]   ;;  %s837_s23 = scalar_lea.hbm %s1063_s2, 384 }
  0x14   :  { %s24_s20 = sshll.u32 %s912_s19, 4  ;;  %p838_p8 = scmp.ne.s32.totalorder %s1063_s2, %s837_s23  ;;  %s25_s20 = int_to_ptr.vmem [resolvable:$true] %s24_s20 }
  0x15   :  { %p841_p9 = scmp.lt.u32.totalorder %s837_s23, %s1063_s2 }
  0x17   :  { %p843_p10 = pnand %p841_p9, %p838_p8 }
  0x19   :  { %846 = shalt.err (!%p843_p10)
}
  0x1a   :  { %s847_s29 = scalar_lea.vmem %s25_s20, 384  ;;  %p852_p12 = scmp.lt.s32.totalorder %s25_s20, %s25_s20 }
  0x1b   :  { %p848_p11 = scmp.ne.s32.totalorder %s25_s20, %s847_s29  ;;  %p853_p13 = scmp.lt.s32.totalorder %s847_s29, %s847_s29 }
  0x1d   :  { %p854_p0 = por %p853_p13, %p852_p12 }
  0x1f   :  { %p855_p1 = pnand %p854_p0, %p848_p11 }
  0x21   :  { %858 = shalt.err (!%p855_p1)
}
  0x22   :  { %s913_s3 = smov 128   ;;  %s914_s28 = smov 8  }
  0x23   :  { %30 = dma.hbm_to_vmem [thread:$0]  %s1063_s2, 384, %s25_s20, [#allocation5], %s913_s3, %s913_s3, %s914_s28  }
  0x24   :  { %s915_s10 = smov [#allocation9]   ;;  %s859_s14 = scalar_lea.hbm %s1065_s4, 3072 }
  0x25   :  { %s48_s11 = sshll.u32 %s915_s10, 4  ;;  %p860_p2 = scmp.ne.s32.totalorder %s1065_s4, %s859_s14  ;;  %s49_s11 = int_to_ptr.vmem [resolvable:$true] %s48_s11 }
  0x26   :  { %p863_p3 = scmp.lt.u32.totalorder %s859_s14, %s1065_s4 }
  0x28   :  { %p865_p4 = pnand %p863_p3, %p860_p2 }
  0x2a   :  { %868 = shalt.err (!%p865_p4)
}
  0x2b   :  { %s869_s22 = scalar_lea.vmem %s49_s11, 3072  ;;  %p874_p6 = scmp.lt.s32.totalorder %s49_s11, %s49_s11 }
  0x2c   :  { %p870_p5 = scmp.ne.s32.totalorder %s49_s11, %s869_s22  ;;  %p875_p7 = scmp.lt.s32.totalorder %s869_s22, %s869_s22 }
  0x2e   :  { %p876_p8 = por %p875_p7, %p874_p6 }
  0x30   :  { %p877_p9 = pnand %p876_p8, %p870_p5 }
  0x32   :  { %880 = shalt.err (!%p877_p9)
}
  0x33   :  { %54 = dma.hbm_to_vmem [thread:$0]  %s1065_s4, 3072, %s49_s11, [#allocation8], %s910_s15, %s910_s15, %s911_s16  }
  0x34   :  { %903 = dma.done.wait [#allocation5], 384  }
  0x35   :  { %904 = vsyncadd [#allocation5], 4294966912 }
  0x36   :  { %905 = dma.done.wait [#allocation8], 6144  }
  0x37   :  { %906 = vsyncadd [#allocation8], 4294961152  ;;  %v916_v0 = vmov 0.0   ;;  %v917_v1 = vmov 0   ;;  %vm918_vm0 = vmmov 0   ;;  %s78_s16 = scalar_lea.vmem [#allocation4], %s1061_s0  ;;  %v569_v63 = vlaneseq }
  0x38   :  { %690 = vmatprep.subr.bf16.mxu1 %v916_v0  ;;  %274 = vmatprep.mubr.bf16.mxu0 %v917_v1  ;;  %v741_v2 = vld [vmem:[#allocation7 + $0x4] ss:$12 sps:$4 sm:$0xff]   ;;  %v743_v3 = vld [vmem:[#allocation7] ss:$12 sps:$4 sm:$0xff]   ;;  %v744_v4 = vld [vmem:[#allocation7 + $0x1c] ss:$12 sps:$4 sm:$0xff]  }
  0x39   :  { %706 = vmatprep.mubr.msk.bf16.mxu1 %vm918_vm0, %v916_v0  ;;  %242 = vmatprep.subr.bf16.mxu0 %v741_v2  ;;  %v746_v5 = vld [vmem:[#allocation7 + $0x18] ss:$12 sps:$4 sm:$0xff]   ;;  %v747_v6 = vld [vmem:[#allocation7 + $0x34] ss:$12 sps:$4 sm:$0xff]   ;;  %v749_v7 = vld [vmem:[#allocation7 + $0x30] ss:$12 sps:$4 sm:$0xff]  }
  0x3a   :  { %243 = vmatpush1.bf16.msra.mxu0 %v743_v3  ;;  %v750_v8 = vld [vmem:[#allocation7 + $0x4c] ss:$12 sps:$4 sm:$0xff]   ;;  %v762_v9 = vld [vmem:[#allocation7 + $0x8] ss:$12 sps:$4 sm:$0xff]   ;;  %v753_v11 = vld [vmem:[#allocation7 + $0x64] ss:$12 sps:$4 sm:$0xff]  }
  0x3b   :  { %244 = vmatprep.subr.bf16.mxu0 %v744_v4  ;;  %v752_v10 = vld [vmem:[#allocation7 + $0x48] ss:$12 sps:$4 sm:$0xff]   ;;  %691 = vmatpush3.bf16.msra.mxu1 %v762_v9  ;;  %v766_v12 = vld [vmem:[#allocation7 + $0x20] ss:$12 sps:$4 sm:$0xff]   ;;  %v770_v15 = vld [vmem:[#allocation7 + $0x38] ss:$12 sps:$4 sm:$0xff]  }
  0x3c   :  { %692 = vmatprep.subr.bf16.mxu1 %v916_v0  ;;  %v755_v13 = vld [vmem:[#allocation7 + $0x60] ss:$12 sps:$4 sm:$0xff]   ;;  %v756_v14 = vld [vmem:[#allocation7 + $0x7c] ss:$12 sps:$4 sm:$0xff]   ;;  %v758_v16 = vld [vmem:[#allocation7 + $0x78] ss:$12 sps:$4 sm:$0xff]  }
  0x3d   :  { %v759_v17 = vld [vmem:[#allocation7 + $0x94] ss:$12 sps:$4 sm:$0xff]   ;;  %v774_v18 = vld [vmem:[#allocation7 + $0x50] ss:$12 sps:$4 sm:$0xff]   ;;  %v763_v20 = vld [vmem:[#allocation7 + $0xac] ss:$12 sps:$4 sm:$0xff]  }
  0x3e   :  { %245 = vmatpush1.bf16.msra.mxu0 %v746_v5  ;;  %v761_v19 = vld [vmem:[#allocation7 + $0x90] ss:$12 sps:$4 sm:$0xff]   ;;  %v778_v21 = vld [vmem:[#allocation7 + $0x68] ss:$12 sps:$4 sm:$0xff]   ;;  %v782_v25 = vld [vmem:[#allocation7 + $0x80] ss:$12 sps:$4 sm:$0xff]  }
  0x3f   :  { %246 = vmatprep.subr.bf16.mxu0 %v747_v6  ;;  %693 = vmatpush3.bf16.msra.mxu1 %v766_v12  ;;  %v765_v22 = vld [vmem:[#allocation7 + $0xa8] ss:$12 sps:$4 sm:$0xff]   ;;  %v769_v24 = vld [vmem:[#allocation9 + $0x4] ss:$12 sps:$4 sm:$0xff]   ;;  %v767_v27 = vld [vmem:[#allocation9] ss:$12 sps:$4 sm:$0xff]  }
  0x40   :  { %694 = vmatprep.subr.bf16.mxu1 %v916_v0  ;;  %v79_v23 = vld [vmem:[%s78_s16] sm:$0x1]  ;;  %v786_v30 = vld [vmem:[#allocation7 + $0x98] ss:$12 sps:$4 sm:$0xff]   ;;  %v777_v32 = vld [vmem:[#allocation9 + $0x34] ss:$12 sps:$4 sm:$0xff]  }
  0x41   :  { %v81_v26 = vpack.c.bf16 %v79_v23, %v79_v23  ;;  %v773_v28 = vld [vmem:[#allocation9 + $0x1c] ss:$12 sps:$4 sm:$0xff]   ;;  %v771_v31 = vld [vmem:[#allocation9 + $0x18] ss:$12 sps:$4 sm:$0xff]   ;;  %v798_v39 = vld [vmem:[#allocation9 + $0x20] ss:$12 sps:$4 sm:$0xff]  }
  0x42   :  { %247 = vmatpush1.bf16.msra.mxu0 %v749_v7  ;;  %v75_v29 = vld [vmem:[%s1062_s1] sm:$0x1]  ;;  %v790_v33 = vld [vmem:[#allocation7 + $0xb0] ss:$12 sps:$4 sm:$0xff]   ;;  %v781_v35 = vld [vmem:[#allocation9 + $0x4c] ss:$12 sps:$4 sm:$0xff]  }
  0x43   :  { %248 = vmatprep.subr.bf16.mxu0 %v750_v8  ;;  %695 = vmatpush3.bf16.msra.mxu1 %v770_v15  ;;  %76 = vst [vmem:[#allocation10] sm:$0x1] %v75_v29  ;;  %v775_v34 = vld [vmem:[#allocation9 + $0x30] ss:$12 sps:$4 sm:$0xff]   ;;  %v794_v36 = vld [vmem:[#allocation9 + $0x8] ss:$12 sps:$4 sm:$0xff]  }
  0x44   :  { %696 = vmatprep.subr.bf16.mxu1 %v916_v0  ;;  %v779_v37 = vld [vmem:[#allocation9 + $0x48] ss:$12 sps:$4 sm:$0xff]   ;;  %v785_v38 = vld [vmem:[#allocation9 + $0x64] ss:$12 sps:$4 sm:$0xff]   ;;  %v783_v40 = vld [vmem:[#allocation9 + $0x60] ss:$12 sps:$4 sm:$0xff]  }
  0x45   :  { %v789_v41 = vld [vmem:[#allocation9 + $0x7c] ss:$12 sps:$4 sm:$0xff]   ;;  %v799_v42 = vld [vmem:[#allocation9 + $0x38] ss:$12 sps:$4 sm:$0xff]   ;;  %v793_v44 = vld [vmem:[#allocation9 + $0x94] ss:$12 sps:$4 sm:$0xff]  }
  0x46   :  { %249 = vmatpush1.bf16.msra.mxu0 %v752_v10  ;;  %v787_v43 = vld [vmem:[#allocation9 + $0x78] ss:$12 sps:$4 sm:$0xff]   ;;  %v800_v45 = vld [vmem:[#allocation9 + $0x50] ss:$12 sps:$4 sm:$0xff]   ;;  %v801_v48 = vld [vmem:[#allocation9 + $0x68] ss:$12 sps:$4 sm:$0xff]  }
  0x47   :  { %250 = vmatprep.subr.bf16.mxu0 %v753_v11  ;;  %697 = vmatpush3.bf16.msra.mxu1 %v774_v18  ;;  %v791_v46 = vld [vmem:[#allocation9 + $0x90] ss:$12 sps:$4 sm:$0xff]   ;;  %v797_v47 = vld [vmem:[#allocation9 + $0xac] ss:$12 sps:$4 sm:$0xff]   ;;  %v795_v49 = vld [vmem:[#allocation9 + $0xa8] ss:$12 sps:$4 sm:$0xff]  }
  0x48   :  { %698 = vmatprep.subr.bf16.mxu1 %v916_v0  ;;  %v802_v51 = vld [vmem:[#allocation9 + $0x80] ss:$12 sps:$4 sm:$0xff]   ;;  %v803_v53 = vld [vmem:[#allocation9 + $0x98] ss:$12 sps:$4 sm:$0xff]   ;;  %v804_v54 = vld [vmem:[#allocation9 + $0xb0] ss:$12 sps:$4 sm:$0xff]  }
  0x49   :  { %v567_v3 = vld [vmem:[%s1066_s5] sm:$0x3]  ;;  %s919_s29 = smov [#allocation10]  }
  0x4a   :  { %251 = vmatpush1.bf16.msra.mxu0 %v755_v13  ;;  %v1032_v50 = vld [vmem:[#allocation10] sm:$0x1]  ;;  %v595_v23 = vld [vmem:[%s1068_s7] sm:$0x1]  ;;  %s611_s3 = sshll.u32 %s919_s29, 4  ;;  %s612_s3 = int_to_ptr.vmem [resolvable:$true] %s611_s3 }
  0x4b   :  { %252 = vmatprep.subr.bf16.mxu0 %v756_v14  ;;  %699 = vmatpush3.bf16.msra.mxu1 %v778_v21  ;;  %v323_v52 = vpack.c.bf16 %v1032_v50, %v1032_v50  ;;  %s881_s7 = scalar_lea.vmem %s612_s3, 16  ;;  %p886_p11 = scmp.lt.s32.totalorder %s612_s3, %s612_s3 }
  0x4c   :  { %700 = vmatprep.subr.bf16.mxu1 %v916_v0  ;;  %p882_p10 = scmp.ne.s32.totalorder %s612_s3, %s881_s7 }
  0x4e   :  { %253 = vmatpush1.bf16.msra.mxu0 %v758_v16 }
  0x4f   :  { %254 = vmatprep.subr.bf16.mxu0 %v759_v17  ;;  %701 = vmatpush3.bf16.msra.mxu1 %v782_v25 }
  0x50   :  { %702 = vmatprep.subr.bf16.mxu1 %v916_v0 }
  0x52   :  { %255 = vmatpush1.bf16.msra.mxu0 %v761_v19 }
  0x53   :  { %256 = vmatprep.subr.bf16.mxu0 %v763_v20  ;;  %703 = vmatpush3.bf16.msra.mxu1 %v786_v30 }
  0x54   :  { %704 = vmatprep.subr.bf16.mxu1 %v916_v0 }
  0x56   :  { %257 = vmatpush1.bf16.msra.mxu0 %v765_v22 }
  0x57   :  { %484 = vmatprep.subr.bf16.mxu0 %v769_v24  ;;  %705 = vmatpush3.bf16.msra.mxu1 %v790_v33 }
  0x58   :  { %710 = vmatprep.subr.bf16.mxu1 %v916_v0 }
  0x59   :  { %275 = vmatmul.mubr.bf16.vlgmr.msra.gmra.mrb[0].mxu0 %v81_v26 }
  0x5a   :  { %485 = vmatpush1.bf16.msra.mxu0 %v767_v27  ;;  %516 = vmatprep.mubr.bf16.mxu0 %v917_v1  ;;  %v570_v1 = vshrl.u32 %v569_v63, 7 }
  0x5b   :  { %486 = vmatprep.subr.bf16.mxu0 %v773_v28  ;;  %707 = vmatmul.mubr.bf16.vlgmr.msra.gmra.mrb[0].mxu1 %v81_v26  ;;  %v593_v26 = vld [vmem:[%s1067_s6] sm:$0x1]  ;;  %s885_s6 = scalar_lea.vmem %s612_s3, 32 }
  0x5c   :  { %711 = vmatpush3.bf16.msra.mxu1 %v794_v36  ;;  %726 = vmatprep.mubr.msk.bf16.mxu1 %vm918_vm0, %v916_v0  ;;  %v571_v2 = vsub.s32 0, %v570_v1  ;;  %v575_v4 = vsub.s32 1, %v570_v1  ;;  %p887_p12 = scmp.lt.s32.totalorder %s885_s6, %s881_s7 }
  0x5d   :  { %712 = vmatprep.subr.bf16.mxu1 %v916_v0 }
  0x5e   :  { %487 = vmatpush1.bf16.msra.mxu0 %v771_v31  ;;  %v572_v5 = vrot.slane %v567_v3, %v571_v2  ;;  %v576_v9 = vrot.slane %v567_v3, %v575_v4  ;;  %p888_p13 = por %p887_p12, %p886_p11 }
  0x5f   :  { %488 = vmatprep.subr.bf16.mxu0 %v777_v32 }
  0x60   :  { %713 = vmatpush3.bf16.msra.mxu1 %v798_v39  ;;  %p889_p0 = pnand %p888_p13, %p882_p10 }
  0x61   :  { %714 = vmatprep.subr.bf16.mxu1 %v916_v0 }
  0x62   :  { %489 = vmatpush1.bf16.msra.mxu0 %v775_v34 }
  0x63   :  { %490 = vmatprep.subr.bf16.mxu0 %v781_v35 }
  0x64   :  { %715 = vmatpush3.bf16.msra.mxu1 %v799_v42 }
  0x65   :  { %716 = vmatprep.subr.bf16.mxu1 %v916_v0 }
  0x66   :  { %491 = vmatpush1.bf16.msra.mxu0 %v779_v37 }
  0x67   :  { %492 = vmatprep.subr.bf16.mxu0 %v785_v38 }
  0x68   :  { %717 = vmatpush3.bf16.msra.mxu1 %v800_v45 }
  0x69   :  { %718 = vmatprep.subr.bf16.mxu1 %v916_v0 }
  0x6a   :  { %493 = vmatpush1.bf16.msra.mxu0 %v783_v40 }
  0x6b   :  { %494 = vmatprep.subr.bf16.mxu0 %v789_v41 }
  0x6c   :  { %719 = vmatpush3.bf16.msra.mxu1 %v801_v48 }
  0x6d   :  { %720 = vmatprep.subr.bf16.mxu1 %v916_v0 }
  0x6e   :  { %495 = vmatpush1.bf16.msra.mxu0 %v787_v43 }
  0x6f   :  { %496 = vmatprep.subr.bf16.mxu0 %v793_v44 }
  0x70   :  { %721 = vmatpush3.bf16.msra.mxu1 %v802_v51 }
  0x71   :  { %722 = vmatprep.subr.bf16.mxu1 %v916_v0 }
  0x72   :  { %497 = vmatpush1.bf16.msra.mxu0 %v791_v46 }
  0x73   :  { %498 = vmatprep.subr.bf16.mxu0 %v797_v47 }
  0x74   :  { %723 = vmatpush3.bf16.msra.mxu1 %v803_v53 }
  0x75   :  { %724 = vmatprep.subr.bf16.mxu1 %v916_v0 }
  0x76   :  { %499 = vmatpush1.bf16.msra.mxu0 %v795_v49 }
  0x78   :  { %725 = vmatpush3.bf16.msra.mxu1 %v804_v54 }
  0x79   :  { %517 = vmatmul.mubr.bf16.vlgmr.msra.gmra.mrb[4].mxu0 %v323_v52 }
  0x7b   :  { %727 = vmatmul.mubr.bf16.vlgmr.msra.gmra.mrb[4].mxu1 %v323_v52 }
 0x12c   :  { %v276_v55 = vpop.f32.mrb[0].mxu0 }
 0x12d   :  { %v278_v56 = vpop.f32.mrb[1].mxu0 }
 0x12e   :  { %v280_v57 = vpop.f32.mrb[2].mxu0  ;;  %v317_v59 = vpop.f32.mrb[0].mxu1 }
 0x12f   :  { %v281_v58 = vpop.f32.mrb[3].mxu0  ;;  %v708_v60 = vpop.f32.mrb[1].mxu1  ;;  %v594_v28 = vadd.f32 %v593_v26, %v317_v59 }
 0x130   :  { %v320_v61 = vpop.f32.mrb[2].mxu1 }
 0x131   :  { %v709_v62 = vpop.f32.mrb[3].mxu1 }
 0x14c   :  { %v518_v0 = vpop.f32.mrb[4].mxu0 }
 0x14d   :  { %v565_v6 = vadd.f32 %v518_v0, %v276_v55  ;;  %v520_v7 = vpop.f32.mrb[5].mxu0 }
 0x14e   :  { %v566_v8 = vadd.f32 %v520_v7, %v278_v56  ;;  %v522_v10 = vpop.f32.mrb[6].mxu0  ;;  %v559_v15 = vpop.f32.mrb[4].mxu1 }
 0x14f   :  { %v579_v11 = vadd.f32 %v572_v5, %v565_v6  ;;  %v523_v12 = vpop.f32.mrb[7].mxu0  ;;  %v728_v17 = vpop.f32.mrb[5].mxu1  ;;  %v596_v25 = vadd.f32 %v595_v23, %v559_v15 }
 0x150   :  { %v580_v14 = vadd.f32 %v576_v9, %v566_v8  ;;  %v562_v18 = vpop.f32.mrb[6].mxu1 }
 0x151   :  { %v670_v13 = vmul.f32 -1.442695, %v579_v11  ;;  %v729_v19 = vpop.f32.mrb[7].mxu1 }
 0x152   :  { %v671_v16 = vmul.f32 -1.442695, %v580_v14 }
 0x153   :  { %805 = vpow2.f32 %v670_v13 }
 0x154   :  { %807 = vpow2.f32 %v671_v16 }
 0x15d   :  { %v806_v20 = vpop.eup %805 }
 0x15e   :  { %v587_v21 = vadd.f32 1.0, %v806_v20  ;;  %v808_v22 = vpop.eup %807 }
 0x15f   :  { %v588_v24 = vadd.f32 1.0, %v808_v22 }
 0x160   :  { %809 = vrcp.f32 %v587_v21 }
 0x161   :  { %811 = vrcp.f32 %v588_v24 }
 0x16a   :  { %v810_v27 = vpop.eup %809 }
 0x16b   :  { %v597_v29 = vmul.f32 %v810_v27, %v596_v25  ;;  %v812_v31 = vpop.eup %811 }
 0x16c   :  { %v600_v32 = vsub.f32 1.0, %v812_v31  ;;  %v602_v35 = vmul.f32 %v812_v31, %v1032_v50 }
 0x16d   :  { %v598_v30 = vadd.f32 %v597_v29, %v594_v28 }
 0x16f   :  { %813 = vtanh.f32 %v598_v30 }
 0x179   :  { %v814_v33 = vpop.eup %813 }
 0x17a   :  { %v601_v34 = vmul.f32 %v814_v33, %v600_v32 }
 0x17c   :  { %v603_v36 = vadd.f32 %v602_v35, %v601_v34 }
 0x17e   :  { %604 = vst [vmem:[#allocation10] sm:$0x1] %v603_v36 }
 0x17f   :  { %892 = shalt.err (!%p889_p0)
}
 0x180   :  { %s893_s9 = scalar_lea.hbm %s1069_s8, 16 }
 0x181   :  { %p894_p1 = scmp.ne.s32.totalorder %s1069_s8, %s893_s9  ;;  %p897_p2 = scmp.lt.u32.totalorder %s893_s9, %s1069_s8 }
 0x183   :  { %p899_p3 = pnand %p897_p2, %p894_p1 }
 0x185   :  { %902 = shalt.err (!%p899_p3)
}
 0x186   :  { %614 = dma.vmem_to_hbm [thread:$0]  %s612_s3, 16, %s1069_s8, [#allocation6]  }
 0x187   :  { %907 = dma.done.wait [#allocation6], 16  }
 0x188   :  { %908 = vsyncadd [#allocation6], 4294967280 }
 0x189   :  { %618 = vsyncpa [#allocation5], 1 }
 0x18a   :  { %619 = vsyncpa [#allocation8], 1 }
 0x18b   :  { %620 = vsyncpa [#allocation6], 1 }

</bundles_post_ra>
